<compile_context>
chip_gen: v7x
topology: tpu7x:2x2x1
jax: 0.10.0
libtpu: 0.0.40
codegen_flags: <defaults>
</compile_context>

<pallas_src>
import jax
import jax.numpy as jnp
from jax import lax
from jax.experimental import pallas as pl
from jax.experimental.pallas import tpu as pltpu


def _pick_tile(n, candidates):
    for c in candidates:
        if n % c == 0:
            return c
    return n


# ---------------------------------------------------------------------------
# 1) Single-step cell kernel (== IndRNNCell.forward, exact f32 math)
# ---------------------------------------------------------------------------
def indrnn_cell_kernel(x_ref, h_ref, w_ref, u_ref, b_ref, o_ref):
    # MXU matmul (f32 accumulate) + VPU elementwise, fused in one kernel.
    xw = jnp.dot(x_ref[...], w_ref[...], preferred_element_type=jnp.float32)
    pre = (h_ref[...].astype(jnp.float32) * u_ref[...].astype(jnp.float32)
           + xw + b_ref[...].astype(jnp.float32))
    o_ref[...] = jnp.maximum(pre, 0.0).astype(o_ref.dtype)


def indrnn_cell(x_t, h_tm1, w, u, b, *, bm=None):
    """Single IndRNN time step: relu(h_tm1 * u + x_t @ w + b).

    Batch-tiled over a 1-D grid with w/u/b resident in VMEM.  Note a single
    step at small batch is inherently MXU-starved (8 of 256 MXU rows on
    v6e/v7x) -- use indrnn_sequence() for whole sequences.
    """
    B, I = x_t.shape
    R = w.shape[1]
    if bm is None:
        bm = _pick_tile(B, (512, 256, 128, 64, 32, 16, 8))
    assert B % bm == 0
    return pl.pallas_call(
        indrnn_cell_kernel,
        out_shape=jax.ShapeDtypeStruct((B, R), x_t.dtype),
        grid_spec=pltpu.PrefetchScalarGridSpec(
            num_scalar_prefetch=0,
            grid=(B // bm,),
            in_specs=[
                pl.BlockSpec((bm, I), lambda i: (i, 0)),   # x batch tile
                pl.BlockSpec((bm, R), lambda i: (i, 0)),   # h batch tile
                pl.BlockSpec((I, R), lambda i: (0, 0)),    # w (resident)
                pl.BlockSpec((1, R), lambda i: (0, 0)),    # u (broadcast in-kernel)
                pl.BlockSpec((1, R), lambda i: (0, 0)),    # b
            ],
            out_specs=pl.BlockSpec((bm, R), lambda i: (i, 0)),
        ),
        compiler_params=pltpu.CompilerParams(
            dimension_semantics=("parallel",)),
    )(x_t, h_tm1, w, u.reshape(1, R), b.reshape(1, R))


# ---------------------------------------------------------------------------
# 2) Fused, time-blocked sequence runner: grid = (B//bt, R//rt, T//Tt)
# ---------------------------------------------------------------------------
def _seq_kernel(x_ref, w_ref, b_ref, u_ref, h0_ref, o_ref, h_scr, xwb_scr):
    ti = pl.program_id(2)

    @pl.when(ti == 0)
    def _():
        h_scr[...] = h0_ref[...].astype(jnp.float32)

    tt, bt, inp = x_ref.shape
    rt = w_ref.shape[1]

    # Fused input projection for the whole time block: one MXU matmul per grid
    # step (bf16 operands by default, f32 accumulate), bias folded in here.
    # Stored to VMEM scratch so the serial loop below is pure VPU work.
    xwb = jnp.dot(x_ref[...].reshape(tt * bt, inp), w_ref[...],
                  preferred_element_type=jnp.float32)
    xwb_scr[...] = xwb.reshape(tt, bt, rt) + b_ref[...].astype(jnp.float32)

    u = u_ref[...].astype(jnp.float32)             # (1, rt), broadcasts over bt

    # Serial recurrence over the Tt sub-steps.  h carried as a loop value
    # (vregs); h_scr is written only once per block (v5e: one vst slot/bundle).
    def step(t, h):
        h_new = jnp.maximum(h * u + xwb_scr[t], 0.0)
        o_ref[t] = h_new.astype(o_ref.dtype)
        return h_new

    h_scr[...] = lax.fori_loop(0, tt, step, h_scr[...], unroll=True)


def indrnn_sequence(x_seq, h0, w, u, b, *, bt=None, rt=None, tt=32,
                    matmul_dtype=jnp.bfloat16, vmem_limit_bytes=None):
    """Apply the IndRNN cell over T timesteps; returns all hidden states.

    x_seq: (T, B, inpdim), h0: (B, recdim) -> (T, B, recdim).
    """
    T, B, I = x_seq.shape
    R = w.shape[1]

    if bt is None:
        bt = _pick_tile(B, (256, 128, 64, 32, 16, 8))
    assert B % bt == 0
    if rt is None:
        rt = _pick_tile(R, (512, 256, 128))
    assert R % rt == 0

    mm_dtype = x_seq.dtype if matmul_dtype is None else matmul_dtype
    x_bytes = jnp.dtype(mm_dtype).itemsize
    o_bytes = jnp.dtype(x_seq.dtype).itemsize

    # Shrink the time block until the double-buffered working set fits well
    # under the scoped VMEM default (v5e 16 MiB, v6e/v7x 32 MiB).
    tt = max(1, min(tt, T))

    def footprint(tt_):
        return (2 * tt_ * bt * I * x_bytes          # streamed x slabs (2 bufs)
                + 2 * tt_ * bt * rt * o_bytes       # streamed out slabs (2 bufs)
                + tt_ * bt * rt * 4                 # xwb scratch
                + 3 * bt * rt * 4                   # h scratch + h0 block (2 bufs)
                + I * rt * x_bytes + 2 * rt * 4)    # resident w, b, u

    while tt > 1 and footprint(tt) > 24 * 1024 * 1024:
        tt //= 2

    # Pad the time axis to a multiple of tt; padded steps are sliced off below
    # and never influence valid outputs (they come after them in time).
    T_pad = pl.cdiv(T, tt) * tt
    if T_pad != T:
        pad = jnp.zeros((T_pad - T, B, I), x_seq.dtype)
        x_in = jnp.concatenate([x_seq, pad], axis=0)
    else:
        x_in = x_seq

    x_in = x_in.astype(mm_dtype)
    w_in = w.astype(mm_dtype)
    b2 = b.reshape(1, R)
    u2 = u.reshape(1, R)

    grid = (B // bt, R // rt, T_pad // tt)          # time innermost / serial

    hs = pl.pallas_call(
        _seq_kernel,
        out_shape=jax.ShapeDtypeStruct((T_pad, B, R), x_seq.dtype),
        grid_spec=pltpu.PrefetchScalarGridSpec(
            num_scalar_prefetch=0,
            grid=grid,
            in_specs=[
                # x streamed one (tt, bt, I) slab at a time (double-buffered).
                pl.BlockSpec((tt, bt, I), lambda bi, ri, ti: (ti, bi, 0)),
                pl.BlockSpec((I, rt), lambda bi, ri, ti: (0, ri)),    # w
                pl.BlockSpec((1, rt), lambda bi, ri, ti: (0, ri)),    # b
                pl.BlockSpec((1, rt), lambda bi, ri, ti: (0, ri)),    # u
                pl.BlockSpec((bt, rt), lambda bi, ri, ti: (bi, ri)),  # h0
            ],
            out_specs=pl.BlockSpec((tt, bt, rt),
                                   lambda bi, ri, ti: (ti, bi, ri)),
            scratch_shapes=[
                pltpu.VMEM((bt, rt), jnp.float32),       # carried hidden state
                pltpu.VMEM((tt, bt, rt), jnp.float32),   # per-block x@w + b
            ],
        ),
        compiler_params=pltpu.CompilerParams(
            # batch and recdim tiles are independent -> both "parallel" so
            # v7x's two TensorCores get work even at small B; time is serial.
            dimension_semantics=("parallel", "parallel", "arbitrary"),
            vmem_limit_bytes=vmem_limit_bytes),
    )(x_in, w_in, b2, u2, h0)

    return hs[:T] if T_pad != T else hs


# ---------------------------------------------------------------------------
if __name__ == "__main__":
    batch, inpdim, recdim, seqlen = 8, 64, 128, 20

    key = jax.random.PRNGKey(0)
    kx, kh, kw, ku, kb, ks = jax.random.split(key, 6)

    x_t = jax.random.normal(kx, (batch, inpdim), dtype=jnp.float32)
    h_tm1 = jax.random.normal(kh, (batch, recdim), dtype=jnp.float32)
    w = jax.random.normal(kw, (inpdim, recdim), dtype=jnp.float32)
    u = jax.random.normal(ku, (recdim,), dtype=jnp.float32)
    b = jax.random.normal(kb, (recdim,), dtype=jnp.float32)

    # --- single-step cell (exactly IndRNNCell.forward, f32) ---
    out = jax.block_until_ready(indrnn_cell(x_t, h_tm1, w, u, b))
    ref = jnp.maximum(h_tm1 * u + x_t @ w + b, 0.0)
    assert out.shape == (batch, recdim)
    assert jnp.allclose(out, ref, atol=1e-5, rtol=1e-5)

    # --- fused sequence runner (same cell applied over T steps) ---
    x_seq = jax.random.normal(ks, (seqlen, batch, inpdim), dtype=jnp.float32)

    # (a) f32-operand matmul path vs pure-f32 scan reference (exact semantics);
    #     tt=8 with T=20 also exercises time blocking + the padded tail block.
    hs32 = jax.block_until_ready(
        indrnn_sequence(x_seq, h_tm1, w, u, b, tt=8, matmul_dtype=None))

    def ref_step_f32(h, x):
        h = jnp.maximum(h * u + x @ w + b, 0.0)
        return h, h

    _, hs_ref32 = lax.scan(ref_step_f32, h_tm1, x_seq)
    assert hs32.shape == (seqlen, batch, recdim)
    assert jnp.allclose(hs32, hs_ref32, atol=1e-4, rtol=1e-4)

    # (b) default bf16-operand matmul path vs a matching bf16-cast reference
    #     (f32 accumulate + f32 recurrence in both).
    hs = jax.block_until_ready(indrnn_sequence(x_seq, h_tm1, w, u, b, tt=8))

    w_bf = w.astype(jnp.bfloat16)

    def ref_step_bf16(h, x):
        xw = jnp.dot(x.astype(jnp.bfloat16), w_bf,
                     preferred_element_type=jnp.float32)
        h = jnp.maximum(h * u + xw + b, 0.0)
        return h, h

    _, hs_ref = lax.scan(ref_step_bf16, h_tm1, x_seq)
    assert hs.shape == (seqlen, batch, recdim)
    assert jnp.allclose(hs, hs_ref, atol=2e-3, rtol=2e-3)

    print("KERNEL_OK")
</pallas_src>

<mosaic_0001>
module attributes {stable_mosaic.version = 11 : i64} {
  func.func @indrnn_cell_kernel(%arg0: i32, %arg1: memref<8x64xf32, #tpu.memory_space<vmem>>, %arg2: memref<8x128xf32, #tpu.memory_space<vmem>>, %arg3: memref<64x128xf32, #tpu.memory_space<vmem>>, %arg4: memref<1x128xf32, #tpu.memory_space<vmem>>, %arg5: memref<1x128xf32, #tpu.memory_space<vmem>>, %arg6: memref<8x128xf32, #tpu.memory_space<vmem>>) attributes {dimension_semantics = [#tpu.dimension_semantics<parallel>], iteration_bounds = array<i64: 1>, scalar_prefetch = 0 : i64, scratch_operands = 0 : i64, tpu.core_type = #tpu.core_type<tc>, window_params = [{transform_indices = @transform_0, window_bounds = array<i64: 8, 64>}, {transform_indices = @transform_1, window_bounds = array<i64: 8, 128>}, {pipeline_mode = #tpu.pipeline_mode<synchronous>, transform_indices = @transform_2, window_bounds = array<i64: 64, 128>}, {pipeline_mode = #tpu.pipeline_mode<synchronous>, transform_indices = @transform_3, window_bounds = array<i64: 1, 128>}, {pipeline_mode = #tpu.pipeline_mode<synchronous>, transform_indices = @transform_4, window_bounds = array<i64: 1, 128>}, {transform_indices = @transform_5, window_bounds = array<i64: 8, 128>}]} {
    %c0 = arith.constant 0 : index
    %c0_0 = arith.constant 0 : index
    %0 = vector.load %arg1[%c0, %c0_0] : memref<8x64xf32, #tpu.memory_space<vmem>>, vector<8x64xf32>
    %c0_1 = arith.constant 0 : index
    %c0_2 = arith.constant 0 : index
    %1 = vector.load %arg3[%c0_1, %c0_2] : memref<64x128xf32, #tpu.memory_space<vmem>>, vector<64x128xf32>
    %cst = arith.constant dense<0.000000e+00> : vector<8x128xf32>
    %2 = tpu.matmul %0, %1, %cst {dimension_numbers = #tpu.dot_dimension_numbers<[1], [0], [0], [1], [0, 0, 1, 1], [], []>} : vector<8x64xf32>, vector<64x128xf32>, vector<8x128xf32> -> vector<8x128xf32>
    %c0_3 = arith.constant 0 : index
    %c0_4 = arith.constant 0 : index
    %3 = vector.load %arg2[%c0_3, %c0_4] : memref<8x128xf32, #tpu.memory_space<vmem>>, vector<8x128xf32>
    %c0_5 = arith.constant 0 : index
    %c0_6 = arith.constant 0 : index
    %4 = vector.load %arg4[%c0_5, %c0_6] : memref<1x128xf32, #tpu.memory_space<vmem>>, vector<1x128xf32>
    %5 = vector.broadcast %4 : vector<1x128xf32> to vector<8x128xf32>
    %6 = arith.mulf %3, %5 : vector<8x128xf32>
    %7 = arith.addf %6, %2 : vector<8x128xf32>
    %c0_7 = arith.constant 0 : index
    %c0_8 = arith.constant 0 : index
    %8 = vector.load %arg5[%c0_7, %c0_8] : memref<1x128xf32, #tpu.memory_space<vmem>>, vector<1x128xf32>
    %9 = vector.broadcast %8 : vector<1x128xf32> to vector<8x128xf32>
    %10 = arith.addf %7, %9 : vector<8x128xf32>
    %cst_9 = arith.constant 0.000000e+00 : f32
    %11 = vector.broadcast %cst_9 : f32 to vector<8x128xf32>
    %12 = arith.maximumf %10, %11 : vector<8x128xf32>
    %c0_10 = arith.constant 0 : index
    %c0_11 = arith.constant 0 : index
    %13 = vector.load %arg6[%c0_10, %c0_11] : memref<8x128xf32, #tpu.memory_space<vmem>>, vector<8x128xf32>
    tpu.vector_store %arg6[%c0_10, %c0_11], %12 {strides = array<i32>} : memref<8x128xf32, #tpu.memory_space<vmem>>, vector<8x128xf32>,
    return
  }
  func.func @transform_0(%arg0: i32) -> (i32, i32) {
    %c0_i32 = arith.constant 0 : i32
    %c0_i32_0 = arith.constant 0 : i32
    return %arg0, %c0_i32 : i32, i32
  }
  func.func @transform_1(%arg0: i32) -> (i32, i32) {
    %c0_i32 = arith.constant 0 : i32
    %c0_i32_0 = arith.constant 0 : i32
    return %arg0, %c0_i32 : i32, i32
  }
  func.func @transform_2(%arg0: i32) -> (i32, i32) {
    %c0_i32 = arith.constant 0 : i32
    %c0_i32_0 = arith.constant 0 : i32
    %c0_i32_1 = arith.constant 0 : i32
    return %c0_i32, %c0_i32_0 : i32, i32
  }
  func.func @transform_3(%arg0: i32) -> (i32, i32) {
    %c0_i32 = arith.constant 0 : i32
    %c0_i32_0 = arith.constant 0 : i32
    %c0_i32_1 = arith.constant 0 : i32
    return %c0_i32, %c0_i32_0 : i32, i32
  }
  func.func @transform_4(%arg0: i32) -> (i32, i32) {
    %c0_i32 = arith.constant 0 : i32
    %c0_i32_0 = arith.constant 0 : i32
    %c0_i32_1 = arith.constant 0 : i32
    return %c0_i32, %c0_i32_0 : i32, i32
  }
  func.func @transform_5(%arg0: i32) -> (i32, i32) {
    %c0_i32 = arith.constant 0 : i32
    %c0_i32_0 = arith.constant 0 : i32
    return %arg0, %c0_i32 : i32, i32
  }
}

</mosaic_0001>

<bundles_post_ra>
// kernel: tpu_custom_call.1
= control target key start
LH: loop header
LB: loop body
LE: loop exit
PB: predicated region body
PF: predicated region fallthrough
CT: control target
= control target key end

     0   :  { %10 = vsyncpa [#allocation3], 0  ;;  %s416_s0 = inlined_call_operand.hbm [shape: f32[8,64], index: 0, kind: input, shape index: {}]   ;;  %s417_s1 = inlined_call_operand.hbm [shape: f32[8,128], index: 1, kind: input, shape index: {}]   ;;  %s418_s2 = inlined_call_operand.hbm [shape: f32[64,128], index: 2, kind: input, shape index: {}]   ;;  %s419_s3 = inlined_call_operand.vmem [shape: f32[1,128], index: 3, kind: input, shape index: {}]   ;;  %s420_s4 = inlined_call_operand.vmem [shape: f32[1,128], index: 4, kind: input, shape index: {}]   ;;  %s421_s5 = inlined_call_operand.hbm [shape: f32[8,128], index: 5, kind: output, shape index: {}]  }
   0x1   :  { %11 = vsyncpa [#allocation6], 0 }
   0x2   :  { %12 = vsyncpa [#allocation4], 0  ;;  %s323_s18 = smov [#allocation5]   ;;  %s324_s20 = smov [#allocation2]  }
   0x3   :  { %s29_s19 = sshll.u32 %s323_s18, 4  ;;  %s19_s21 = sshll.u32 %s324_s20, 4  ;;  %s30_s19 = int_to_ptr.vmem [resolvable:$true] %s29_s19  ;;  %s20_s21 = int_to_ptr.vmem [resolvable:$true] %s19_s21 }
   0x4   :  { %s229_s24 = scalar_lea.hbm %s417_s1, 128 }
   0x5   :  { %p230_p0 = scmp.ne.s32.totalorder %s417_s1, %s229_s24  ;;  %p233_p1 = scmp.lt.u32.totalorder %s229_s24, %s417_s1 }
   0x7   :  { %p235_p2 = pnand %p233_p1, %p230_p0 }
   0x9   :  { %238 = shalt.err (!%p235_p2)
}
   0xa   :  { %s239_s29 = scalar_lea.vmem %s30_s19, 128  ;;  %p244_p4 = scmp.lt.s32.totalorder %s30_s19, %s30_s19 }
   0xb   :  { %p240_p3 = scmp.ne.s32.totalorder %s30_s19, %s239_s29  ;;  %p245_p5 = scmp.lt.s32.totalorder %s239_s29, %s239_s29 }
   0xd   :  { %p246_p6 = por %p245_p5, %p244_p4 }
   0xf   :  { %p247_p7 = pnand %p246_p6, %p240_p3 }
  0x11   :  { %250 = shalt.err (!%p247_p7)
}
  0x12   :  { %32 = dma.hbm_to_vmem [thread:$0]  %s417_s1, 128, %s30_s19, [#allocation6]  }
  0x13   :  { %s251_s9 = scalar_lea.hbm %s416_s0, 128 }
  0x14   :  { %p252_p8 = scmp.ne.s32.totalorder %s416_s0, %s251_s9  ;;  %p255_p9 = scmp.lt.u32.totalorder %s251_s9, %s416_s0 }
  0x16   :  { %p257_p10 = pnand %p255_p9, %p252_p8 }
  0x18   :  { %260 = shalt.err (!%p257_p10)
}
  0x19   :  { %s261_s14 = scalar_lea.vmem %s20_s21, 128  ;;  %p266_p12 = scmp.lt.s32.totalorder %s20_s21, %s20_s21 }
  0x1a   :  { %p262_p11 = scmp.ne.s32.totalorder %s20_s21, %s261_s14  ;;  %p267_p13 = scmp.lt.s32.totalorder %s261_s14, %s261_s14 }
  0x1c   :  { %p268_p0 = por %p267_p13, %p266_p12 }
  0x1e   :  { %p269_p1 = pnand %p268_p0, %p262_p11 }
  0x20   :  { %272 = shalt.err (!%p269_p1)
}
  0x21   :  { %22 = dma.hbm_to_vmem [thread:$0]  %s416_s0, 128, %s20_s21, [#allocation3]  }
  0x22   :  { %s325_s16 = smov [#allocation7]   ;;  %s273_s20 = scalar_lea.hbm %s418_s2, 1024 }
  0x23   :  { %s38_s17 = sshll.u32 %s325_s16, 4  ;;  %p274_p2 = scmp.ne.s32.totalorder %s418_s2, %s273_s20  ;;  %s39_s17 = int_to_ptr.vmem [resolvable:$true] %s38_s17 }
  0x24   :  { %p277_p3 = scmp.lt.u32.totalorder %s273_s20, %s418_s2 }
  0x26   :  { %p279_p4 = pnand %p277_p3, %p274_p2 }
  0x28   :  { %282 = shalt.err (!%p279_p4)
}
  0x29   :  { %s283_s26 = scalar_lea.vmem %s39_s17, 1024  ;;  %p288_p6 = scmp.lt.s32.totalorder %s39_s17, %s39_s17 }
  0x2a   :  { %p284_p5 = scmp.ne.s32.totalorder %s39_s17, %s283_s26  ;;  %p289_p7 = scmp.lt.s32.totalorder %s283_s26, %s283_s26 }
  0x2c   :  { %p290_p8 = por %p289_p7, %p288_p6 }
  0x2e   :  { %p291_p9 = pnand %p290_p8, %p284_p5 }
  0x30   :  { %294 = shalt.err (!%p291_p9)
}
  0x31   :  { %s326_s0 = smov 128   ;;  %s327_s21 = smov 8  }
  0x32   :  { %44 = dma.hbm_to_vmem [thread:$0]  %s418_s2, 1024, %s39_s17, [#allocation6], %s326_s0, %s326_s0, %s327_s21  }
  0x33   :  { %317 = dma.done.wait [#allocation3], 128  }
  0x34   :  { %318 = vsyncadd [#allocation3], 4294967168 }
  0x35   :  { %319 = dma.done.wait [#allocation6], 1152  }
  0x36   :  { %320 = vsyncadd [#allocation6], 4294966144  ;;  %v328_v0 = vmov 0.0|0.0   ;;  %vm329_vm0 = vmmov 0   ;;  %v330_v1 = vmov 0.0   ;;  %v59_v2 = vld [vmem:[#allocation7] sm:$0xff] }
  0x37   :  { %208 = vmatprep.subr.bf16.mxu0 %v328_v0  ;;  %205 = vmatprep.mubr.msk.f32.mxu0 %vm329_vm0, %v330_v1  ;;  %v60_v3 = vld [vmem:[#allocation7 + $0x8] sm:$0xff]  ;;  %v61_v4 = vld [vmem:[#allocation7 + $0x10] sm:$0xff]  ;;  %v62_v6 = vld [vmem:[#allocation7 + $0x18] sm:$0xff]  ;;  %vm67_vm1 = vcmask 523264   ;;  %s331_s7 = smov [#allocation8]  }
  0x38   :  { %v209_v5 = vpack.c.bf16 %v60_v3, %v59_v2  ;;  %v212_v7 = vpack.c.bf16 %v62_v6, %v61_v4  ;;  %v63_v8 = vld [vmem:[#allocation7 + $0x20] sm:$0xff]  ;;  %v64_v9 = vld [vmem:[#allocation7 + $0x28] sm:$0xff]  ;;  %v65_v11 = vld [vmem:[#allocation7 + $0x30] sm:$0xff]  ;;  %s167_s8 = sshll.u32 %s331_s7, 4  ;;  %s168_s8 = int_to_ptr.vmem [resolvable:$true] %s167_s8 }
  0x39   :  { %v215_v10 = vpack.c.bf16 %v64_v9, %v63_v8  ;;  %v66_v12 = vld [vmem:[#allocation7 + $0x38] sm:$0xff]  ;;  %v58_v14 = vld [vmem:[#allocation2] sm:$0xff]  ;;  %s295_s9 = scalar_lea.vmem %s168_s8, 128  ;;  %p300_p11 = scmp.lt.s32.totalorder %s168_s8, %s168_s8 }
  0x3a   :  { %210 = vmatpush3.bf16.msra.mxu0 %v209_v5  ;;  %v218_v13 = vpack.c.bf16 %v66_v12, %v65_v11  ;;  %v141_v15 = vld [vmem:[#allocation5] sm:$0xff]  ;;  %v178_v16 = vld [vmem:[%s419_s3] ss:$0 sm:$0xff]  ;;  %p296_p10 = scmp.ne.s32.totalorder %s168_s8, %s295_s9  ;;  %p301_p12 = scmp.lt.s32.totalorder %s295_s9, %s295_s9 }
  0x3b   :  { %211 = vmatprep.subr.bf16.mxu0 %v328_v0  ;;  %v149_v17 = vmul.f32 %v178_v16, %v141_v15  ;;  %v179_v19 = vld [vmem:[%s420_s4] ss:$0 sm:$0xff] }
  0x3c   :  { %p302_p13 = por %p301_p12, %p300_p11 }
  0x3e   :  { %213 = vmatpush3.bf16.msra.mxu0 %v212_v7  ;;  %p303_p0 = pnand %p302_p13, %p296_p10 }
  0x3f   :  { %214 = vmatprep.subr.bf16.mxu0 %v328_v0 }
  0x42   :  { %216 = vmatpush3.bf16.msra.mxu0 %v215_v10 }
  0x43   :  { %217 = vmatprep.subr.bf16.mxu0 %v328_v0 }
  0x46   :  { %219 = vmatpush3.bf16.msra.mxu0 %v218_v13 }
  0x49   :  { %206 = vmatmul.mubr.msk.f32.vlgmr.msra.gmra.mrb[0].mxu0 %vm67_vm1, %v58_v14 }
 0x11c   :  { %v137_v18 = vpop.f32.mrb[0].mxu0 }
 0x11d   :  { %v150_v20 = vadd.f32 %v149_v17, %v137_v18  ;;  %v207_v21 = vpop.f32.mrb[1].mxu0 }
 0x11f   :  { %v158_v22 = vadd.f32 %v179_v19, %v150_v20 }
 0x121   :  { %v159_v23 = vmax.f32 %v158_v22, 0.0 }
 0x123   :  { %160 = vst [vmem:[#allocation8] sm:$0xff] %v159_v23 }
 0x124   :  { %306 = shalt.err (!%p303_p0)
}
 0x125   :  { %s307_s11 = scalar_lea.hbm %s421_s5, 128 }
 0x126   :  { %p308_p1 = scmp.ne.s32.totalorder %s421_s5, %s307_s11  ;;  %p311_p2 = scmp.lt.u32.totalorder %s307_s11, %s421_s5 }
 0x128   :  { %p313_p3 = pnand %p311_p2, %p308_p1 }
 0x12a   :  { %316 = shalt.err (!%p313_p3)
}
 0x12b   :  { %170 = dma.vmem_to_hbm [thread:$0]  %s168_s8, 128, %s421_s5, [#allocation4]  }
 0x12c   :  { %321 = dma.done.wait [#allocation4], 128  }
 0x12d   :  { %322 = vsyncadd [#allocation4], 4294967168 }
 0x12e   :  { %174 = vsyncpa [#allocation3], 1 }
 0x12f   :  { %175 = vsyncpa [#allocation6], 1 }
 0x130   :  { %176 = vsyncpa [#allocation4], 1 }

</bundles_post_ra>
